<compile_context>
chip_gen: v7x
topology: tpu7x:2x2x1
jax: 0.10.0
libtpu: 0.0.40
codegen_flags: <defaults>
</compile_context>

<pallas_src>
import jax
import jax.numpy as jnp
from jax.experimental import pallas as pl
from jax.experimental.pallas import tpu as pltpu


def _round_up(a, b):
    return (a + b - 1) // b * b


def _residual_block_kernel(xc_ref, wfg_ref, wsr_ref, bsr_ref, res_ref, skip_ref):
    # xc_ref:  (1, 2C, TT) caller dtype; rows [:C] = conv tap 0, rows [C:] = tap 1
    #          (tap 1 is also the residual-add operand inputs[:, :, -t_out:]).
    # wfg_ref: (2C, 2C) bf16   fused [filter; gate] x [tap0 | tap1] weights
    # wsr_ref: (Cs+C, C) bf16  fused [skip; residual] 1x1 weights
    # bsr_ref: (Cs+C, 1) f32   fused [skip; residual] bias
    # res_ref: (1, C, TT)      skip_ref: (1, Cs, TT)
    C = res_ref.shape[1]
    Cs = skip_ref.shape[1]

    xc = xc_ref[0]
    x1_f32 = xc[C:].astype(jnp.float32)       # exact residual-add operand
    xc_b = xc.astype(jnp.bfloat16)            # MXU operand

    # Dilated conv (kernel_size=2, no bias), filter & gate fused on M, taps on K:
    #   fg[:C] = filter_conv(x), fg[C:] = gate_conv(x)     -- single matmul
    fg = jnp.dot(wfg_ref[...], xc_b, preferred_element_type=jnp.float32)   # (2C, TT)

    gated = jnp.tanh(fg[:C]) * jax.nn.sigmoid(fg[C:])                      # (C, TT) f32

    # Fused skip + residual 1x1 convs: single matmul + fused bias, then row-split.
    sr = jnp.dot(wsr_ref[...], gated.astype(jnp.bfloat16),
                 preferred_element_type=jnp.float32) + bsr_ref[...]        # (Cs+C, TT)

    skip_ref[0] = sr[:Cs].astype(skip_ref.dtype)
    res_ref[0] = (sr[Cs:] + x1_f32).astype(res_ref.dtype)


def residual_block(x, wf, wg, ws, bs, wr, br, *, dilation):
    """x: (B, C, T). wf/wg: (C, C, 2) PyTorch Conv1d weights (bias=False).
    ws: (Cs, C, 1), bs: (Cs,), wr: (C, C, 1), br: (C,).
    Returns (res_out (B, C, T-dilation), skip_out (B, Cs, T-dilation))."""
    B, C, T = x.shape
    Cs = ws.shape[0]
    t_out = T - dilation
    if t_out <= 0:
        raise ValueError(f"dilation ({dilation}) must be < T ({T})")

    out_dtype = jnp.float32

    # Lane-dense time tiling: pad t_out to a multiple of 128 and pick the
    # largest tile in {512, 256, 128} that divides the padded length.
    P = _round_up(t_out, 128)
    TT = 512 if P % 512 == 0 else (256 if P % 256 == 0 else 128)
    pad = P - t_out

    # Both conv taps stacked on the channel axis (single aligned input per tile).
    x0 = x[:, :, :t_out]
    x1 = x[:, :, dilation:dilation + t_out]
    xcat = jnp.concatenate([x0, x1], axis=1)                               # (B, 2C, t_out)
    if pad:
        xcat = jnp.pad(xcat, ((0, 0), (0, 0), (0, pad)))                   # (B, 2C, P)

    # Fused weights (bf16 MXU operands).
    #   rows: [filter_out (C); gate_out (C)], cols: [tap0 (C) | tap1 (C)]
    wfg = jnp.concatenate(
        [jnp.concatenate([wf[:, :, 0], wf[:, :, 1]], axis=1),
         jnp.concatenate([wg[:, :, 0], wg[:, :, 1]], axis=1)],
        axis=0).astype(jnp.bfloat16)                                       # (2C, 2C)
    wsr = jnp.concatenate([ws[:, :, 0], wr[:, :, 0]], axis=0
                          ).astype(jnp.bfloat16)                           # (Cs+C, C)
    bsr = jnp.concatenate([bs, br], axis=0).reshape(Cs + C, 1
                          ).astype(jnp.float32)                            # (Cs+C, 1)

    n_t = P // TT
    grid_spec = pltpu.PrefetchScalarGridSpec(
        num_scalar_prefetch=0,
        grid=(B, n_t),
        in_specs=[
            pl.BlockSpec((1, 2 * C, TT), lambda b, t: (b, 0, t)),          # x taps
            pl.BlockSpec((2 * C, 2 * C), lambda b, t: (0, 0)),             # filt+gate W
            pl.BlockSpec((Cs + C, C), lambda b, t: (0, 0)),                # skip+res W
            pl.BlockSpec((Cs + C, 1), lambda b, t: (0, 0)),                # skip+res b
        ],
        out_specs=[
            pl.BlockSpec((1, C, TT), lambda b, t: (b, 0, t)),
            pl.BlockSpec((1, Cs, TT), lambda b, t: (b, 0, t)),
        ],
    )

    res_p, skip_p = pl.pallas_call(
        _residual_block_kernel,
        out_shape=(
            jax.ShapeDtypeStruct((B, C, P), out_dtype),
            jax.ShapeDtypeStruct((B, Cs, P), out_dtype),
        ),
        grid_spec=grid_spec,
        compiler_params=pltpu.CompilerParams(
            dimension_semantics=("parallel", "parallel"),
            vmem_limit_bytes=64 * 1024 * 1024,
        ),
    )(xcat, wfg, wsr, bsr)

    return res_p[:, :, :t_out], skip_p[:, :, :t_out]


def _reference(x, wf, wg, ws, bs, wr, br, dilation):
    # Pure-JAX f32 reference matching PyTorch semantics.
    B, C, T = x.shape
    t_out = T - dilation
    x0 = x[:, :, :t_out]
    x1 = x[:, :, dilation:dilation + t_out]
    filt = (jnp.einsum('oi,bit->bot', wf[:, :, 0], x0)
            + jnp.einsum('oi,bit->bot', wf[:, :, 1], x1))
    gate = (jnp.einsum('oi,bit->bot', wg[:, :, 0], x0)
            + jnp.einsum('oi,bit->bot', wg[:, :, 1], x1))
    gated = jax.nn.sigmoid(gate) * jnp.tanh(filt)
    skip = jnp.einsum('oi,bit->bot', ws[:, :, 0], gated) + bs[None, :, None]
    res = jnp.einsum('oi,bit->bot', wr[:, :, 0], gated) + br[None, :, None]
    return res + x1, skip


if __name__ == "__main__":
    B, C, Cs, T, dilation = 2, 4, 8, 16, 2

    key = jax.random.PRNGKey(0)
    k = jax.random.split(key, 7)
    x = jax.random.normal(k[0], (B, C, T), dtype=jnp.float32)
    # PyTorch weight layouts: Conv1d weight (out, in, kernel_size)
    wf = jax.random.normal(k[1], (C, C, 2), dtype=jnp.float32) * 0.3   # filter_conv (bias=False)
    wg = jax.random.normal(k[2], (C, C, 2), dtype=jnp.float32) * 0.3   # gate_conv   (bias=False)
    ws = jax.random.normal(k[3], (Cs, C, 1), dtype=jnp.float32) * 0.3  # skip_conv
    bs = jax.random.normal(k[4], (Cs,), dtype=jnp.float32) * 0.1
    wr = jax.random.normal(k[5], (C, C, 1), dtype=jnp.float32) * 0.3   # residual_conv
    br = jax.random.normal(k[6], (C,), dtype=jnp.float32) * 0.1

    res_out, skip_out = residual_block(x, wf, wg, ws, bs, wr, br, dilation=dilation)
    jax.block_until_ready((res_out, skip_out))

    res_ref, skip_ref = _reference(x, wf, wg, ws, bs, wr, br, dilation)
    assert res_out.shape == (B, C, T - dilation)
    assert skip_out.shape == (B, Cs, T - dilation)
    # bf16 matmul operands (f32 accumulation) -> looser tolerance vs f32 reference.
    assert jnp.allclose(res_out, res_ref, atol=5e-2, rtol=1e-2), "res_out mismatch"
    assert jnp.allclose(skip_out, skip_ref, atol=5e-2, rtol=1e-2), "skip_out mismatch"

    print("KERNEL_OK")
</pallas_src>

<mosaic_0001>
module attributes {stable_mosaic.version = 11 : i64} {
  func.func @_residual_block_kernel(%arg0: i32, %arg1: i32, %arg2: memref<1x8x128xf32, #tpu.memory_space<vmem>>, %arg3: memref<8x8xbf16, #tpu.memory_space<vmem>>, %arg4: memref<12x4xbf16, #tpu.memory_space<vmem>>, %arg5: memref<12x1xf32, #tpu.memory_space<vmem>>, %arg6: memref<1x4x128xf32, #tpu.memory_space<vmem>>, %arg7: memref<1x8x128xf32, #tpu.memory_space<vmem>>) attributes {dimension_semantics = [#tpu.dimension_semantics<parallel>, #tpu.dimension_semantics<parallel>], iteration_bounds = array<i64: 2, 1>, scalar_prefetch = 0 : i64, scratch_operands = 0 : i64, tpu.core_type = #tpu.core_type<tc>, window_params = [{transform_indices = @transform_0, window_bounds = array<i64: 1, 8, 128>}, {pipeline_mode = #tpu.pipeline_mode<synchronous>, transform_indices = @transform_1, window_bounds = array<i64: 8, 8>}, {pipeline_mode = #tpu.pipeline_mode<synchronous>, transform_indices = @transform_2, window_bounds = array<i64: 12, 4>}, {pipeline_mode = #tpu.pipeline_mode<synchronous>, transform_indices = @transform_3, window_bounds = array<i64: 12, 1>}, {transform_indices = @transform_4, window_bounds = array<i64: 1, 4, 128>}, {transform_indices = @transform_5, window_bounds = array<i64: 1, 8, 128>}]} {
    %c0 = arith.constant 0 : index
    %c0_0 = arith.constant 0 : index
    %c0_1 = arith.constant 0 : index
    %0 = vector.load %arg2[%c0, %c0_0, %c0_1] : memref<1x8x128xf32, #tpu.memory_space<vmem>>, vector<1x8x128xf32>
    %1 = vector.shape_cast %0 : vector<1x8x128xf32> to vector<8x128xf32>
    %2 = vector.extract_strided_slice %1 {offsets = [4, 0], sizes = [4, 128], strides = [1, 1]} : vector<8x128xf32> to vector<4x128xf32>
    %3 = arith.truncf %1 : vector<8x128xf32> to vector<8x128xbf16>
    %c0_2 = arith.constant 0 : index
    %c0_3 = arith.constant 0 : index
    %4 = vector.load %arg3[%c0_2, %c0_3] : memref<8x8xbf16, #tpu.memory_space<vmem>>, vector<8x8xbf16>
    %cst = arith.constant dense<0.000000e+00> : vector<8x128xf32>
    %5 = tpu.matmul %4, %3, %cst {dimension_numbers = #tpu.dot_dimension_numbers<[1], [0], [0], [1], [0, 0, 1, 1], [], []>} : vector<8x8xbf16>, vector<8x128xbf16>, vector<8x128xf32> -> vector<8x128xf32>
    %6 = vector.extract_strided_slice %5 {offsets = [0, 0], sizes = [4, 128], strides = [1, 1]} : vector<8x128xf32> to vector<4x128xf32>
    %7 = math.tanh %6 : vector<4x128xf32>
    %8 = vector.extract_strided_slice %5 {offsets = [4, 0], sizes = [4, 128], strides = [1, 1]} : vector<8x128xf32> to vector<4x128xf32>
    %9 = arith.negf %8 : vector<4x128xf32>
    %10 = math.exp %9 : vector<4x128xf32>
    %cst_4 = arith.constant 1.000000e+00 : f32
    %11 = vector.broadcast %cst_4 : f32 to vector<4x128xf32>
    %12 = arith.addf %11, %10 : vector<4x128xf32>
    %13 = arith.divf %11, %12 : vector<4x128xf32>
    %14 = arith.mulf %7, %13 : vector<4x128xf32>
    %c0_5 = arith.constant 0 : index
    %c0_6 = arith.constant 0 : index
    %15 = vector.load %arg4[%c0_5, %c0_6] : memref<12x4xbf16, #tpu.memory_space<vmem>>, vector<12x4xbf16>
    %16 = arith.truncf %14 : vector<4x128xf32> to vector<4x128xbf16>
    %cst_7 = arith.constant dense<0.000000e+00> : vector<12x128xf32>
    %17 = tpu.matmul %15, %16, %cst_7 {dimension_numbers = #tpu.dot_dimension_numbers<[1], [0], [0], [1], [0, 0, 1, 1], [], []>} : vector<12x4xbf16>, vector<4x128xbf16>, vector<12x128xf32> -> vector<12x128xf32>
    %c0_8 = arith.constant 0 : index
    %c0_9 = arith.constant 0 : index
    %18 = vector.load %arg5[%c0_8, %c0_9] : memref<12x1xf32, #tpu.memory_space<vmem>>, vector<12x1xf32>
    %19 = vector.broadcast %18 : vector<12x1xf32> to vector<12x128xf32>
    %20 = arith.addf %17, %19 : vector<12x128xf32>
    %21 = vector.extract_strided_slice %20 {offsets = [0, 0], sizes = [8, 128], strides = [1, 1]} : vector<12x128xf32> to vector<8x128xf32>
    %c0_10 = arith.constant 0 : index
    %c0_11 = arith.constant 0 : index
    %c0_12 = arith.constant 0 : index
    %22 = vector.load %arg7[%c0_10, %c0_11, %c0_12] : memref<1x8x128xf32, #tpu.memory_space<vmem>>, vector<1x8x128xf32>
    %23 = vector.shape_cast %22 : vector<1x8x128xf32> to vector<8x128xf32>
    %24 = vector.shape_cast %21 : vector<8x128xf32> to vector<1x8x128xf32>
    tpu.vector_store %arg7[%c0_10, %c0_11, %c0_12], %24 {strides = array<i32>} : memref<1x8x128xf32, #tpu.memory_space<vmem>>, vector<1x8x128xf32>,
    %25 = vector.extract_strided_slice %20 {offsets = [8, 0], sizes = [4, 128], strides = [1, 1]} : vector<12x128xf32> to vector<4x128xf32>
    %26 = arith.addf %25, %2 : vector<4x128xf32>
    %c0_13 = arith.constant 0 : index
    %c0_14 = arith.constant 0 : index
    %c0_15 = arith.constant 0 : index
    %27 = vector.load %arg6[%c0_13, %c0_14, %c0_15] : memref<1x4x128xf32, #tpu.memory_space<vmem>>, vector<1x4x128xf32>
    %28 = vector.shape_cast %27 : vector<1x4x128xf32> to vector<4x128xf32>
    %29 = vector.shape_cast %26 : vector<4x128xf32> to vector<1x4x128xf32>
    tpu.vector_store %arg6[%c0_13, %c0_14, %c0_15], %29 {strides = array<i32>} : memref<1x4x128xf32, #tpu.memory_space<vmem>>, vector<1x4x128xf32>,
    return
  }
  func.func @transform_0(%arg0: i32, %arg1: i32) -> (i32, i32, i32) {
    %c0_i32 = arith.constant 0 : i32
    %c0_i32_0 = arith.constant 0 : i32
    return %arg0, %c0_i32, %arg1 : i32, i32, i32
  }
  func.func @transform_1(%arg0: i32, %arg1: i32) -> (i32, i32) {
    %c0_i32 = arith.constant 0 : i32
    %c0_i32_0 = arith.constant 0 : i32
    %c0_i32_1 = arith.constant 0 : i32
    return %c0_i32, %c0_i32_0 : i32, i32
  }
  func.func @transform_2(%arg0: i32, %arg1: i32) -> (i32, i32) {
    %c0_i32 = arith.constant 0 : i32
    %c0_i32_0 = arith.constant 0 : i32
    %c0_i32_1 = arith.constant 0 : i32
    return %c0_i32, %c0_i32_0 : i32, i32
  }
  func.func @transform_3(%arg0: i32, %arg1: i32) -> (i32, i32) {
    %c0_i32 = arith.constant 0 : i32
    %c0_i32_0 = arith.constant 0 : i32
    %c0_i32_1 = arith.constant 0 : i32
    return %c0_i32, %c0_i32_0 : i32, i32
  }
  func.func @transform_4(%arg0: i32, %arg1: i32) -> (i32, i32, i32) {
    %c0_i32 = arith.constant 0 : i32
    %c0_i32_0 = arith.constant 0 : i32
    return %arg0, %c0_i32, %arg1 : i32, i32, i32
  }
  func.func @transform_5(%arg0: i32, %arg1: i32) -> (i32, i32, i32) {
    %c0_i32 = arith.constant 0 : i32
    %c0_i32_0 = arith.constant 0 : i32
    return %arg0, %c0_i32, %arg1 : i32, i32, i32
  }
}

</mosaic_0001>

<bundles_post_ra>
// kernel: tpu_custom_call.1
= control target key start
LH: loop header
LB: loop body
LE: loop exit
PB: predicated region body
PF: predicated region fallthrough
CT: control target
= control target key end

     0   :  { %s1378_s0 = inlined_call_operand.hbm [shape: f32[2,8,128], index: 0, kind: input, shape index: {}]   ;;  %s1379_s1 = inlined_call_operand.hbm [shape: bf16[8,8], index: 1, kind: input, shape index: {}]   ;;  %s1380_s2 = inlined_call_operand.hbm [shape: bf16[12,4], index: 2, kind: input, shape index: {}]   ;;  %s1381_s3 = inlined_call_operand.hbm [shape: f32[12,1], index: 3, kind: input, shape index: {}]   ;;  %s1382_s4 = inlined_call_operand.hbm [shape: f32[2,4,128], index: 4, kind: output, shape index: {0}]   ;;  %s1383_s5 = inlined_call_operand.hbm [shape: f32[2,8,128], index: 5, kind: output, shape index: {1}]  }
   0x1   :  { %1388 = sst [smem:[#allocation18_spill]] %s1379_s1 }
   0x2   :  { %11 = vsyncpa [#allocation3], 0 }
   0x3   :  { %13 = vsyncpa [#allocation3 + $0x1], 0 }
   0x4   :  { %14 = vsyncpa [#allocation6], 0 }
   0x5   :  { %15 = vsyncpa [#allocation9], 0 }
   0x6   :  { %16 = vsyncpa [#allocation4], 0 }
   0x7   :  { %18 = vsyncpa [#allocation4 + $0x1], 0 }
   0x8   :  { %19 = vsyncpa [#allocation12], 0 }
   0x9   :  { %21 = vsyncpa [#allocation12 + $0x1], 0  ;;  %s1062_s18 = smov 0   ;;  %s1064_s19 = smov 0  }
   0xa   :  { %s1066_s20 = smov 0   ;;  %s1068_s21 = smov 0  }
   0xb   :  { %s1070_s22 = smov 0   ;;  %s1072_s23 = smov 0  }
   0xc LB: > { %s626_s24 = sadd.s32 4294967295, %s1017_s23   ;;  %s627_s25 = sadd.s32 4294967294, %s1017_s23   ;;  %s1017_s23 = sphi %s1072_s23, %s27_s23   ;;  %s1013_s22 = sphi %s1070_s22, %s1409_s22   ;;  %s1009_s21 = sphi %s1068_s21, %s1408_s21   ;;  %s1005_s20 = sphi %s1066_s20, %s1407_s20   ;;  %s1001_s19 = sphi %s1064_s19, %s1406_s19   ;;  %s997_s18 = sphi %s1062_s18, %s1405_s18  }
   0xd   : > { %p61_p0 = scmp.ne.s32.totalorder %s1001_s19, %s997_s18  ;;  %p1096_p1 = scmp.eq.s32.totalorder %s626_s24, 0 }
   0xe   : > { %p1100_p2 = scmp.eq.s32.totalorder %s626_s24, 1  ;;  %p156_p3 = scmp.eq.s32.totalorder %s627_s25, 1 }
   0xf   : > { %s1389_s26 = scalar_select %p1096_p1, 1, 0 }
  0x10   : > { %s1390_s27 = scalar_select %p1100_p2, 1, 0 }
  0x11   : > { %p1106_p4 = por %p1096_p1, %p61_p0  ;;  %p628_p5 = scmp.ge.s32.totalorder %s1017_s23, 1 }
  0x12   : > { %p1111_p6 = por %p156_p3, %p61_p0  ;;  %p191_p7 = scmp.lt.s32.totalorder %s1017_s23, 3 }
  0x13   : > { %s1391_s28 = scalar_select %p1106_p4, 1, 0 }
  0x14   : > { %s1392_s29 = scalar_select %p1111_p6, 1, 0 }
  0x15   : > { %p1116_p8 = pnand %p628_p5, %p191_p7  ;;  %s1019_s6 = smov [#allocation5]  }
  0x16   : > { %s204_s7 = sshll.u32 %s1019_s6, 4  ;;  %s1020_s8 = smov [#allocation7]   ;;  %s205_s7 = int_to_ptr.vmem [resolvable:$true] %s204_s7 }
  0x17   : > { %s1393_s30 = scalar_select %p1116_p8, 1, 0 }
  0x18   : > { %p686_p10 = pneg %p1116_p8  ;;  %s214_s9 = sshll.u32 %s1020_s8, 4  ;;  %s1129_s9 = int_to_ptr.vmem [resolvable:$true] %s214_s9 }
  0x19   : > { %s1021_s11 = smov [#allocation8]   ;;  %s1395_s1 = sld [smem:[#allocation18_spill]] }
  0x1a   : > { %p1125_p11 = pnand %p686_p10, %p1096_p1  ;;  %s1131_s12 = sshll.u32 %s1021_s11, 4  ;;  %s228_s12 = int_to_ptr.vmem [resolvable:$true] %s1131_s12 }
  0x1c   : > { %p1141_p13 = pneg %p1125_p11 }
  0x1f   : > { %s781_s15 = scalar_lea.hbm %s1395_s1, 64 }
  0x20   : > { %p782_p12 = scmp.ne.s32.totalorder %s1395_s1, %s781_s15  ;;  %p788_p5 = scmp.lt.u32.totalorder %s781_s15, %s1395_s1 }
  0x22   : > { %p784_p0 = pnand %p1141_p13, %p782_p12 }
  0x24   : > { %p785_p3 = pneg %p784_p0 }
  0x26   : > { %p790_p7 = pnand %p788_p5, %p785_p3 }
  0x28   : > { %793 = shalt.err (!%p790_p7)
}
  0x29   : > { %s794_s8 = scalar_lea.vmem %s205_s7, 64  ;;  %p802_p1 = scmp.lt.s32.totalorder %s205_s7, %s205_s7 }
  0x2a   : > { %p795_p10 = scmp.ne.s32.totalorder %s205_s7, %s794_s8  ;;  %p803_p4 = scmp.lt.s32.totalorder %s794_s8, %s794_s8 }
  0x2c   : > { %p797_p9 = pnand %p795_p10, %p1141_p13  ;;  %p804_p8 = por %p803_p4, %p802_p1 }
  0x2e   : > { %p798_p6 = pneg %p797_p9 }
  0x30   : > { %p805_p2 = pnand %p804_p8, %p798_p6 }
  0x32   : > { %808 = shalt.err (!%p805_p2)
}
  0x33   : > { %689 = dma.hbm_to_vmem [thread:$0]  (!%p1125_p11), %s1395_s1, 64, %s205_s7, [#allocation6]  }
  0x34   : > { %s809_s16 = scalar_lea.hbm %s1380_s2, 128 }
  0x35   : > { %p810_p9 = scmp.ne.s32.totalorder %s1380_s2, %s809_s16  ;;  %p816_p2 = scmp.lt.u32.totalorder %s809_s16, %s1380_s2 }
  0x37   : > { %p812_p12 = pnand %p810_p9, %p1141_p13 }
  0x39   : > { %p813_p1 = pneg %p812_p12 }
  0x3b   : > { %p818_p4 = pnand %p816_p2, %p813_p1 }
  0x3d   : > { %821 = shalt.err (!%p818_p4)
}
  0x3e   : > { %s822_s7 = scalar_lea.vmem %s1129_s9, 128  ;;  %p830_p3 = scmp.lt.s32.totalorder %s1129_s9, %s1129_s9 }
  0x3f   : > { %p823_p6 = scmp.ne.s32.totalorder %s1129_s9, %s822_s7  ;;  %p831_p5 = scmp.lt.s32.totalorder %s822_s7, %s822_s7 }
  0x41   : > { %p825_p8 = pnand %p823_p6, %p1141_p13  ;;  %p832_p7 = por %p831_p5, %p830_p3 }
  0x43   : > { %p826_p0 = pneg %p825_p8 }
  0x45   : > { %p833_p10 = pnand %p832_p7, %p826_p0 }
  0x47   : > { %836 = shalt.err (!%p833_p10)
}
  0x48   : > { %s1022_s11 = smov 64   ;;  %s1023_s13 = smov 4  }
  0x49   : > { %692 = dma.hbm_to_vmem [thread:$0]  (!%p1125_p11), %s1380_s2, 128, %s1129_s9, [#allocation6], %s1022_s11, %s1022_s11, %s1023_s13  }
  0x4a   : > { %s837_s25 = scalar_lea.hbm %s1381_s3, 256 }
  0x4b   : > { %p838_p9 = scmp.ne.s32.totalorder %s1381_s3, %s837_s25  ;;  %p844_p2 = scmp.lt.u32.totalorder %s837_s25, %s1381_s3 }
  0x4d   : > { %p840_p12 = pnand %p838_p9, %p1141_p13 }
  0x4f   : > { %p841_p1 = pneg %p840_p12 }
  0x51   : > { %p846_p4 = pnand %p844_p2, %p841_p1 }
  0x53   : > { %849 = shalt.err (!%p846_p4)
}
  0x54   : > { %s850_s14 = scalar_lea.vmem %s228_s12, 256  ;;  %p858_p3 = scmp.lt.s32.totalorder %s228_s12, %s228_s12 }
  0x55   : > { %p851_p6 = scmp.ne.s32.totalorder %s228_s12, %s850_s14  ;;  %p859_p5 = scmp.lt.s32.totalorder %s850_s14, %s850_s14 }
  0x57   : > { %p853_p8 = pnand %p851_p6, %p1141_p13  ;;  %p860_p7 = por %p859_p5, %p858_p3 }
  0x59   : > { %p854_p0 = pneg %p853_p8 }
  0x5b   : > { %p861_p10 = pnand %p860_p7, %p854_p0 }
  0x5d   : > { %864 = shalt.err (!%p861_p10)
}
  0x5e   : > { %s1024_s9 = smov 128   ;;  %s1025_s1 = smov 8  }
  0x5f   : > { %695 = dma.hbm_to_vmem [thread:$0]  (!%p1125_p11), %s1381_s3, 256, %s228_s12, [#allocation9], %s1024_s9, %s1024_s9, %s1025_s1  }
  0x60   : > { %s48_s13 = sadd.s32 1, %s1005_s20  ;;  %s39_s15 = sadd.s32 1, %s1013_s22 }
  0x61   : > { %p55_p13 = scmp.ne.s32.totalorder %s1005_s20, %s1001_s19  ;;  %p41_p9 = scmp.ge.s32.totalorder %s39_s15, 2 }
  0x62   : > { %p56_p12 = scmp.eq.s32.totalorder %s1017_s23, 0  ;;  %p1397_p1 = scmp.ne.s32.totalorder %s1390_s27, 0 }
  0x63   : > { %p710_p4 = scmp.lt.s32.totalorder %s1017_s23, 2  ;;  %s1411_s15 = smov (%p41_p9, %s39_s15), 0 }
  0x64   : > { %p1206_p2 = por %p1397_p1, %p55_p13  ;;  %p57_p6 = por %p56_p12, %p55_p13 }
  0x65   : > { %s241_s10 = sand.u32 1, %s1005_s20   ;;  %s43_s17 = ssub.s32 %s1013_s22, %s1411_s15 }
  0x66   : > { %p46_p8 = scmp.eq.s32.totalorder %s43_s17, 0  ;;  %s633_s12 = sshll.u32 %s241_s10, 3 }
  0x67   : > { %s634_s25 = sshll.u32 %s1013_s22, 7  ;;  %s245_s14 = scalar_lea.vmem [#allocation2], %s633_s12 }
  0x68   : > { %s1218_s6 = scalar_select %p46_p8, %s1005_s20, %s48_s13  }
  0x69   : > { %s1223_s27 = scalar_lea.hbm %s1378_s0, %s634_s25  ;;  %s253_s9 = sshll.u32 %s245_s14, 4  ;;  %s1225_s9 = int_to_ptr.vmem [resolvable:$true] %s253_s9 }
  0x6a   : > { %p1229_p11 = pnand %p710_p4, %p57_p6  ;;  %s242_s24 = scalar_lea.sflag [#allocation3], %s241_s10 }
  0x6b   : > { %s865_s11 = scalar_lea.hbm %s1223_s27, 128  ;;  %s870_s12 = scalar_lea.hbm %s1378_s0, 256 }
  0x6c   : > { %p866_p0 = scmp.ne.s32.totalorder %s1223_s27, %s865_s11  ;;  %p867_p3 = pneg %p1229_p11 }
  0x6d   : > { %p871_p10 = scmp.lt.u32.totalorder %s1223_s27, %s1378_s0  ;;  %p872_p13 = scmp.lt.u32.totalorder %s870_s12, %s865_s11 }
  0x6e   : > { %p868_p5 = pnand %p867_p3, %p866_p0  ;;  %p874_p12 = scmp.lt.u32.totalorder %s865_s11, %s1223_s27 }
  0x6f   : > { %p873_p9 = por %p872_p13, %p871_p10 }
  0x70   : > { %p869_p7 = pneg %p868_p5 }
  0x71   : > { %p875_p1 = por %p874_p12, %p873_p9 }
  0x73   : > { %p876_p4 = pnand %p875_p1, %p869_p7 }
  0x75   : > { %879 = shalt.err (!%p876_p4)
}
  0x76   : > { %s880_s10 = scalar_lea.vmem %s1225_s9, 128  ;;  %s1026_s7 = smov [#allocation2]  }
  0x77   : > { %p881_p6 = scmp.ne.s32.totalorder %s1225_s9, %s880_s10  ;;  %s885_s14 = sshll.u32 %s1026_s7, 4  ;;  %s886_s14 = int_to_ptr.vmem [resolvable:$false] %s885_s14 }
  0x78   : > { %s887_s13 = scalar_lea.vmem %s886_s14, 256  ;;  %p888_p5 = scmp.lt.s32.totalorder %s1225_s9, %s886_s14 }
  0x79   : > { %p883_p8 = pnand %p881_p6, %p867_p3  ;;  %p889_p10 = scmp.lt.s32.totalorder %s887_s13, %s880_s10 }
  0x7b   : > { %p884_p0 = pneg %p883_p8  ;;  %p890_p13 = por %p889_p10, %p888_p5 }
  0x7d   : > { %p891_p9 = pnand %p890_p13, %p884_p0 }
  0x7f   : > { %894 = shalt.err (!%p891_p9)
}
  0x80   : > { %699 = dma.hbm_to_vmem [thread:$0]  (!%p1229_p11), %s1223_s27, 128, %s1225_s9, %s242_s24  }
  0x81   : > { %p1400_p7 = scmp.ne.s32.totalorder %s1393_s30, 0 }
  0x82   : > { %s1261_s11 = sand.u32 (!%p1400_p7), 1, %s1001_s19   ;;  %p1401_p3 = scmp.ne.s32.totalorder (!%p1400_p7), %s1391_s28, 0 }
  0x83   : > { %262 = sbr.rel (%p1400_p7) target bundleno = 650 (0x28a), region = 36  ;;  %s636_s17 = sshll.u32 (!%p1400_p7), %s1261_s11, 3 }
  0x84   : > { %s265_s12 = scalar_lea.sflag (!%p1400_p7), [#allocation3], %s1261_s11  ;;  %s268_s25 = scalar_lea.vmem (!%p1400_p7), [#allocation2], %s636_s17 }
  0x8a   : > { %976 = dma.done.wait (%p1401_p3), %s265_s12, 128  }
  0x8b   : > { %978 = vsyncadd (%p1401_p3), %s265_s12, 4294967168  ;;  %p1402_p11 = scmp.ne.s32.totalorder %s1389_s26, 0 }
  0x8d   : > { %980 = dma.done.wait (%p1402_p11), [#allocation6], 192  }
  0x8e   : > { %982 = vsyncadd (%p1402_p11), [#allocation6], 4294967104 }
  0x8f   : > { %984 = dma.done.wait (%p1402_p11), [#allocation9], 256  }
  0x90   : > { %986 = vsyncadd (%p1402_p11), [#allocation9], 4294967040  ;;  %v1027_v0 = vmov 0.0   ;;  %vm1028_vm0 = vmmov 0   ;;  %v1279_v1 = vld [vmem:[%s268_s25] sm:$0xff]  ;;  %vm320_vm1 = vcmask 1043456  }
  0x91   : > { %656 = vmatprep.subr.bf16.mxu0 %v1027_v0  ;;  %658 = vmatprep.mubr.msk.bf16.mxu0 %vm1028_vm0, %v1027_v0  ;;  %v314_v2 = vpack.c.bf16 %v1279_v1, %v1279_v1  ;;  %v315_v4 = vld [vmem:[#allocation5] sm:$0xf]  ;;  %vm316_vm2 = vcmask 64512   ;;  %v379_v5 = vld [vmem:[#allocation8 + $0x8] sm:$0xf]  ;;  %v1029_v6 = vmov 0  }
  0x92   : > { %662 = vmatprep.subr.bf16.mxu1 %v1027_v0  ;;  %664 = vmatprep.mubr.msk.bf16.mxu1 %vm1028_vm0, %v1027_v0  ;;  %v378_v7 = vld [vmem:[#allocation8] sm:$0xff]  ;;  %vm399_vm3 = vcmask 1041408   ;;  %v774_v21 = vld [vmem:[#allocation7] sm:$0x3f]   ;;  %vm395_vm4 = vcmask 31744   ;;  %s640_s26 = sshll.u32 %s1261_s11, 2 }
  0x93   : > { %v322_v3 = vsel %vm320_vm1, %v314_v2, 0  ;;  %773 = vset.pattern.permute.xlu0 %v1029_v6  ;;  %s649_s28 = sshll.u32 %s1009_s21, 7  ;;  %s311_s30 = scalar_lea.vmem [#allocation11], %s636_s17  ;;  %v446_v27 = vrot.slane %v1279_v1, 4 }
  0x94   : > { %657 = vmatpush3.bf16.msra.mxu0 %v322_v3  ;;  %387 = vperm.xlu0 %773, %v379_v5   ;;  %s484_s27 = sshll.u32 %s311_s30, 4  ;;  %s1291_s24 = scalar_lea.hbm %s1383_s5, %s649_s28  ;;  %s1293_s27 = int_to_ptr.vmem [resolvable:$true] %s484_s27 }
  0x95   : > { %s648_s8 = sshll.u32 %s1009_s21, 6  ;;  %s1296_s10 = scalar_lea.vmem [#allocation10], %s640_s26 }
  0x96   : > { %s470_s7 = sshll.u32 %s1296_s10, 4  ;;  %s456_s14 = scalar_lea.sflag [#allocation12], %s1261_s11  ;;  %s1330_s7 = int_to_ptr.vmem [resolvable:$true] %s470_s7 }
  0x97   : > { %659 = vmatmul.mubr.msk.bf16.vlgmr.msra.gmra.mrb[0].mxu0 %vm316_vm2, %v315_v4  ;;  %s895_s13 = scalar_lea.vmem %s1293_s27, 128  ;;  %s1030_s17 = smov [#allocation11]  }
  0x98   : > { %382 = vperm.xlu0 %773, %v378_v7   ;;  %p896_p12 = scmp.ne.s32.totalorder %s1293_s27, %s895_s13  ;;  %s899_s12 = sshll.u32 %s1030_s17, 4  ;;  %s900_s12 = int_to_ptr.vmem [resolvable:$false] %s899_s12 }
  0x99   : > { %s901_s25 = scalar_lea.vmem %s900_s12, 256  ;;  %p902_p6 = scmp.lt.s32.totalorder %s1293_s27, %s900_s12 }
  0x9a   : > { %p897_p1 = pnand %p896_p12, %p1206_p2  ;;  %p903_p8 = scmp.lt.s32.totalorder %s901_s25, %s895_s13 }
  0x9c   : > { %p898_p4 = pneg %p897_p1  ;;  %p904_p0 = por %p903_p8, %p902_p6 }
  0x9e   : > { %p905_p5 = pnand %p904_p0, %p898_p4 }
 0x113   : > { %v388_v22 = vpop.permute.xlu0 %387 }
 0x117   : > { %v383_v23 = vpop.permute.xlu0 %382 }
 0x16a   : > { %v358_v8 = vpop.f32.mrb[0].mxu0 }
 0x16b   : > { %v643_v9 = vmul.f32 -1.442695, %v358_v8  ;;  %v660_v10 = vpop.f32.mrb[1].mxu0 }
 0x16c   : > { %v361_v11 = vpop.f32.mrb[2].mxu0 }
 0x16d   : > { %775 = vpow2.f32 %v643_v9  ;;  %v661_v12 = vpop.f32.mrb[3].mxu0 }
 0x177   : > { %v776_v13 = vpop.eup %775 }
 0x178   : > { %v368_v14 = vadd.f32 1.0, %v776_v13 }
 0x17a   : > { %777 = vrcp.f32 %v368_v14 }
 0x17b   : > { %779 = vtanh.f32 %v358_v8 }
 0x184   : > { %v778_v15 = vpop.eup %777 }
 0x185   : > { %v372_v16 = vrot.slane %v778_v15, 4  ;;  %v780_v17 = vpop.eup %779 }
 0x187   : > { %v374_v18 = vmul.f32 %v780_v17, %v372_v16 }
 0x189   : > { %v377_v19 = vpack.c.bf16 %v374_v18, %v374_v18 }
 0x18b   : > { %v401_v20 = vsel %vm399_vm3, %v377_v19, 0 }
 0x18c   : > { %663 = vmatpush3.bf16.msra.mxu1 %v401_v20 }
 0x18f   : > { %665 = vmatmul.mubr.msk.bf16.vlgmr.msra.gmra.mrb[0].mxu1 %vm395_vm4, %v774_v21 }
 0x262   : > { %v437_v24 = vpop.f32.mrb[0].mxu1 }
 0x263   : > { %v438_v25 = vadd.f32 %v437_v24, %v383_v23  ;;  %v666_v26 = vpop.f32.mrb[1].mxu1 }
 0x264   : > { %v440_v28 = vpop.f32.mrb[2].mxu1 }
 0x265   : > { %444 = vst [vmem:[%s311_s30] sm:$0xff] %v438_v25  ;;  %v441_v29 = vadd.f32 %v440_v28, %v388_v22  ;;  %v667_v30 = vpop.f32.mrb[3].mxu1 }
 0x266   : > { %908 = shalt.err (!%p905_p5)
}
 0x267   : > { %s909_s26 = scalar_lea.hbm %s1291_s24, 128  ;;  %s913_s9 = scalar_lea.hbm %s1383_s5, 256 }
 0x268   : > { %p910_p10 = scmp.ne.s32.totalorder %s1291_s24, %s909_s26  ;;  %p914_p7 = scmp.lt.u32.totalorder %s1291_s24, %s1383_s5 }
 0x269   : > { %p915_p3 = scmp.lt.u32.totalorder %s913_s9, %s909_s26  ;;  %p917_p12 = scmp.lt.u32.totalorder %s909_s26, %s1291_s24 }
 0x26a   : > { %p911_p13 = pnand %p910_p10, %p1206_p2 }
 0x26b   : > { %p916_p11 = por %p915_p3, %p914_p7 }
 0x26c   : > { %p912_p9 = pneg %p911_p13 }
 0x26d   : > { %p918_p1 = por %p917_p12, %p916_p11 }
 0x26f   : > { %p919_p4 = pnand %p918_p1, %p912_p9 }
 0x271   : > { %922 = shalt.err (!%p919_p4)
}
 0x272   : > { %683 = dma.vmem_to_hbm [thread:$0]  (%p1206_p2), %s1293_s27, 128, %s1291_s24, %s456_s14   ;;  %v448_v31 = vadd.f32 %v446_v27, %v441_v29 }
 0x273   : > { %s1326_s25 = scalar_lea.hbm %s1382_s4, %s648_s8  ;;  %s451_s26 = scalar_lea.sflag [#allocation4], %s1261_s11 }
 0x274   : > { %449 = vst [vmem:[%s1296_s10] sm:$0xf] %v448_v31  ;;  %s923_s28 = scalar_lea.vmem %s1330_s7, 64  ;;  %s1031_s27 = smov [#allocation10]  }
 0x275   : > { %p924_p6 = scmp.ne.s32.totalorder %s1330_s7, %s923_s28  ;;  %s927_s21 = sshll.u32 %s1031_s27, 4  ;;  %s928_s21 = int_to_ptr.vmem [resolvable:$false] %s927_s21 }
 0x276   : > { %s929_s24 = scalar_lea.vmem %s928_s21, 128  ;;  %p930_p5 = scmp.lt.s32.totalorder %s1330_s7, %s928_s21 }
 0x277   : > { %p925_p8 = pnand %p924_p6, %p1206_p2  ;;  %p931_p10 = scmp.lt.s32.totalorder %s929_s24, %s923_s28 }
 0x279   : > { %p926_p0 = pneg %p925_p8  ;;  %p932_p13 = por %p931_p10, %p930_p5 }
 0x27b   : > { %p933_p9 = pnand %p932_p13, %p926_p0 }
 0x27d   : > { %936 = shalt.err (!%p933_p9)
}
 0x27e   : > { %s937_s11 = scalar_lea.hbm %s1326_s25, 64  ;;  %s941_s14 = scalar_lea.hbm %s1382_s4, 128 }
 0x27f   : > { %p938_p7 = scmp.ne.s32.totalorder %s1326_s25, %s937_s11  ;;  %p942_p12 = scmp.lt.u32.totalorder %s1326_s25, %s1382_s4 }
 0x280   : > { %p943_p1 = scmp.lt.u32.totalorder %s941_s14, %s937_s11  ;;  %p945_p6 = scmp.lt.u32.totalorder %s937_s11, %s1326_s25 }
 0x281   : > { %p939_p3 = pnand %p938_p7, %p1206_p2 }
 0x282   : > { %p944_p4 = por %p943_p1, %p942_p12 }
 0x283   : > { %p940_p11 = pneg %p939_p3 }
 0x284   : > { %p946_p8 = por %p945_p6, %p944_p4 }
 0x286   : > { %p947_p0 = pnand %p946_p8, %p940_p11 }
 0x288   : > { %950 = shalt.err (!%p947_p0)
}
 0x289   : > { %682 = dma.vmem_to_hbm [thread:$0]  (%p1206_p2), %s1330_s7, 64, %s1326_s25, %s451_s26  }
 0x28a PF: > { %s496_s1 = sand.u32 1, %s997_s18   ;;  %p1403_p5 = scmp.ne.s32.totalorder %s1392_s29, 0 }
 0x28b   : > { %p1404_p10 = scmp.ge.s32.totalorder %s1017_s23, 2  ;;  %s497_s17 = scalar_lea.sflag [#allocation4], %s496_s1 }
 0x28d   : > { %p701_p13 = pnand %p1404_p10, %p1403_p5 }
 0x28f   : > { %988 = dma.done.wait (!%p701_p13), %s497_s17, 64  }
 0x290   : > { %990 = vsyncadd (!%p701_p13), %s497_s17, 4294967232  ;;  %s506_s13 = scalar_lea.sflag [#allocation12], %s496_s1 }
 0x291   : > { %992 = dma.done.wait (!%p701_p13), %s506_s13, 128  }
 0x292   : > { %994 = vsyncadd (!%p701_p13), %s506_s13, 4294967168  ;;  %s27_s23 = sadd.s32 1, %s1017_s23   ;;  %s1405_s18 = smov %s1001_s19 }
 0x293   : > { %p24_p9 = scmp.ge.s32.totalorder %s27_s23, 4   ;;  %s1406_s19 = smov %s1005_s20 }
 0x294   : > { %s1407_s20 = smov %s1218_s6  ;;  %s1408_s21 = smov %s1013_s22 }
 0x295   : > { %s1409_s22 = smov %s1411_s15  ;;  %26 = sbr.rel (!%p24_p9) target bundleno = 12 (0xc), region = 110 }
 0x29c   :  { %511 = vsyncpa [#allocation3], 1 }
 0x29d   :  { %513 = vsyncpa [#allocation3 + $0x1], 1 }
 0x29e   :  { %514 = vsyncpa [#allocation6], 1 }
 0x29f   :  { %515 = vsyncpa [#allocation9], 1 }
 0x2a0   :  { %516 = vsyncpa [#allocation4], 1 }
 0x2a1   :  { %518 = vsyncpa [#allocation4 + $0x1], 1 }
 0x2a2   :  { %519 = vsyncpa [#allocation12], 1 }
 0x2a3   :  { %521 = vsyncpa [#allocation12 + $0x1], 1 }

</bundles_post_ra>
